<compile_context>
chip_gen: v7x
topology: tpu7x:2x2x1
jax: 0.10.0
libtpu: 0.0.40
codegen_flags: <defaults>
</compile_context>

<pallas_src>
import functools

import jax
import jax.numpy as jnp
from jax.experimental import pallas as pl
from jax.experimental.pallas import tpu as pltpu


def _layernorm_kernel(x_ref, alpha_ref, bias_ref, o_ref, *, eps, features):
    x = x_ref[...].astype(jnp.float32)            # (block_rows, H)
    alpha = alpha_ref[...].astype(jnp.float32)    # (1, H)
    bias = bias_ref[...].astype(jnp.float32)      # (1, H)

    # Row-wise mean / unbiased std (torch.std default divides by N-1).
    mean = jnp.mean(x, axis=-1, keepdims=True)    # (block_rows, 1)
    centered = x - mean
    denom = max(features - 1, 1)                  # guard H == 1
    var = jnp.sum(centered * centered, axis=-1, keepdims=True) * (1.0 / denom)
    std = jnp.sqrt(var)

    # One reciprocal per row instead of an H-wide divide per row; the rest of
    # the math is broadcast multiplies (keeps VALU pressure low and the kernel
    # DMA-bound). approx=True would push this onto the EUP at reduced
    # precision; exact form is kept so results bit-match the reference divide.
    inv = pl.reciprocal(std + eps, approx=False)  # (block_rows, 1)

    # alpha * (x - mean) / (std + eps) + bias
    out = centered * inv * alpha + bias
    # Exactly one full-width store per tile (keeps the vst slot unsaturated).
    o_ref[...] = out.astype(o_ref.dtype)


def _choose_block_rows(rows, H, itemsize, max_tile_bytes=2 << 20):
    """Largest multiple-of-8 row tile that keeps one (block_rows, H) buffer
    under max_tile_bytes (double-buffered in+out => 4x that in VMEM)."""
    cap = max(8, (max_tile_bytes // max(H * itemsize, 1)) // 8 * 8)
    cap = min(cap, 1024)
    needed = ((rows + 7) // 8) * 8          # rows rounded up to sublane multiple
    return max(8, min(cap, needed))


def layer_normalization(x, alpha, bias, eps=1e-6, block_rows=None):
    """x: (..., H); alpha, bias: (H,)"""
    orig_shape = x.shape
    H = orig_shape[-1]
    rows = 1
    for d in orig_shape[:-1]:
        rows *= d
    x2 = x.reshape(rows, H)
    alpha2 = alpha.reshape(1, H)
    bias2 = bias.reshape(1, H)

    itemsize = jnp.dtype(x.dtype).itemsize
    if block_rows is None:
        block_rows = _choose_block_rows(rows, H, itemsize)

    # No host-side padding: cdiv grid, Pallas masks the partial last block.
    grid = (pl.cdiv(rows, block_rows),)

    # VMEM budget: 2x double-buffered input tile + 2x output tile at IO dtype,
    # plus f32 intermediates for the in-kernel math, params, and headroom.
    tile_bytes = block_rows * H * itemsize
    f32_tmp_bytes = block_rows * H * 4
    param_bytes = 2 * H * jnp.dtype(alpha.dtype).itemsize
    vmem_bytes = 4 * tile_bytes + 6 * f32_tmp_bytes + 8 * param_bytes + (2 << 20)
    vmem_bytes = int(min(max(vmem_bytes, 8 << 20), 32 << 20))  # safe on v5e/v6e/v7x

    kernel = functools.partial(_layernorm_kernel, eps=eps, features=H)

    # NOTE: if the deployed model has H < 128, a lane-dense repack (folding rows
    # into the lane axis) would avoid masked partial stores; for typical
    # H >= 512 the layout below is already lane-dense.
    out = pl.pallas_call(
        kernel,
        out_shape=jax.ShapeDtypeStruct((rows, H), x.dtype),
        grid_spec=pltpu.PrefetchScalarGridSpec(
            num_scalar_prefetch=0,
            grid=grid,
            in_specs=[
                pl.BlockSpec((block_rows, H), lambda i: (i, 0)),
                pl.BlockSpec((1, H), lambda i: (0, 0)),
                pl.BlockSpec((1, H), lambda i: (0, 0)),
            ],
            out_specs=pl.BlockSpec((block_rows, H), lambda i: (i, 0)),
        ),
        compiler_params=pltpu.CompilerParams(
            dimension_semantics=("parallel",),   # lets v7x shard rows over 2 TCs
            vmem_limit_bytes=vmem_bytes,
        ),
    )(x2, alpha2, bias2)

    return out.reshape(orig_shape)


def _reference(x, alpha, bias, eps=1e-6):
    x32 = x.astype(jnp.float32)
    mean = jnp.mean(x32, axis=-1, keepdims=True)
    # unbiased std like torch.std
    var = jnp.sum((x32 - mean) ** 2, axis=-1, keepdims=True) / (x.shape[-1] - 1)
    std = jnp.sqrt(var)
    return (alpha * (x32 - mean) / (std + eps) + bias).astype(x.dtype)


if __name__ == "__main__":
    key = jax.random.PRNGKey(0)
    batch, seq, hidden = 2, 8, 32
    x = jax.random.normal(key, (batch, seq, hidden), dtype=jnp.float32)

    # deterministic parameter init matching nn.Parameter(torch.ones/zeros(features))
    alpha = jnp.ones((hidden,), dtype=jnp.float32)
    bias = jnp.zeros((hidden,), dtype=jnp.float32)

    out = layer_normalization(x, alpha, bias, eps=1e-6)
    out = jax.block_until_ready(out)

    ref = _reference(x, alpha, bias, eps=1e-6)
    assert out.shape == x.shape
    assert jnp.allclose(out, ref, atol=1e-5, rtol=1e-5), "mismatch vs reference"

    print("KERNEL_OK")
</pallas_src>

<mosaic_0001>
module attributes {stable_mosaic.version = 11 : i64} {
  func.func @_layernorm_kernel(%arg0: i32, %arg1: memref<16x32xf32, #tpu.memory_space<vmem>>, %arg2: memref<1x32xf32, #tpu.memory_space<vmem>>, %arg3: memref<1x32xf32, #tpu.memory_space<vmem>>, %arg4: memref<16x32xf32, #tpu.memory_space<vmem>>) attributes {dimension_semantics = [#tpu.dimension_semantics<parallel>], iteration_bounds = array<i64: 1>, scalar_prefetch = 0 : i64, scratch_operands = 0 : i64, tpu.core_type = #tpu.core_type<tc>, window_params = [{transform_indices = @transform_0, window_bounds = array<i64: 16, 32>}, {pipeline_mode = #tpu.pipeline_mode<synchronous>, transform_indices = @transform_1, window_bounds = array<i64: 1, 32>}, {pipeline_mode = #tpu.pipeline_mode<synchronous>, transform_indices = @transform_2, window_bounds = array<i64: 1, 32>}, {transform_indices = @transform_3, window_bounds = array<i64: 16, 32>}]} {
    %c0 = arith.constant 0 : index
    %c0_0 = arith.constant 0 : index
    %0 = vector.load %arg1[%c0, %c0_0] : memref<16x32xf32, #tpu.memory_space<vmem>>, vector<16x32xf32>
    %c0_1 = arith.constant 0 : index
    %c0_2 = arith.constant 0 : index
    %1 = vector.load %arg2[%c0_1, %c0_2] : memref<1x32xf32, #tpu.memory_space<vmem>>, vector<1x32xf32>
    %c0_3 = arith.constant 0 : index
    %c0_4 = arith.constant 0 : index
    %2 = vector.load %arg3[%c0_3, %c0_4] : memref<1x32xf32, #tpu.memory_space<vmem>>, vector<1x32xf32>
    %cst = arith.constant dense<0.000000e+00> : vector<16xf32>
    %3 = vector.multi_reduction <add>, %0, %cst [1] : vector<16x32xf32> to vector<16xf32>
    %4 = vector.shape_cast %3 : vector<16xf32> to vector<16x1xf32>
    %cst_5 = arith.constant 3.200000e+01 : f32
    %5 = vector.broadcast %cst_5 : f32 to vector<16x1xf32>
    %6 = arith.divf %4, %5 : vector<16x1xf32>
    %7 = vector.broadcast %6 : vector<16x1xf32> to vector<16x32xf32>
    %8 = arith.subf %0, %7 : vector<16x32xf32>
    %9 = arith.mulf %8, %8 : vector<16x32xf32>
    %cst_6 = arith.constant dense<0.000000e+00> : vector<16xf32>
    %10 = vector.multi_reduction <add>, %9, %cst_6 [1] : vector<16x32xf32> to vector<16xf32>
    %11 = vector.shape_cast %10 : vector<16xf32> to vector<16x1xf32>
    %cst_7 = arith.constant 0.0322580636 : f32
    %12 = vector.broadcast %cst_7 : f32 to vector<16x1xf32>
    %13 = arith.mulf %11, %12 : vector<16x1xf32>
    %14 = math.sqrt %13 : vector<16x1xf32>
    %cst_8 = arith.constant 9.99999997E-7 : f32
    %15 = vector.broadcast %cst_8 : f32 to vector<16x1xf32>
    %16 = arith.addf %14, %15 : vector<16x1xf32>
    %17 = tpu.reciprocal %16 : vector<16x1xf32> -> vector<16x1xf32>
    %18 = vector.broadcast %17 : vector<16x1xf32> to vector<16x32xf32>
    %19 = arith.mulf %8, %18 : vector<16x32xf32>
    %20 = vector.broadcast %1 : vector<1x32xf32> to vector<16x32xf32>
    %21 = arith.mulf %19, %20 : vector<16x32xf32>
    %22 = vector.broadcast %2 : vector<1x32xf32> to vector<16x32xf32>
    %23 = arith.addf %21, %22 : vector<16x32xf32>
    %c0_9 = arith.constant 0 : index
    %c0_10 = arith.constant 0 : index
    %24 = vector.load %arg4[%c0_9, %c0_10] : memref<16x32xf32, #tpu.memory_space<vmem>>, vector<16x32xf32>
    tpu.vector_store %arg4[%c0_9, %c0_10], %23 {strides = array<i32>} : memref<16x32xf32, #tpu.memory_space<vmem>>, vector<16x32xf32>,
    return
  }
  func.func @transform_0(%arg0: i32) -> (i32, i32) {
    %c0_i32 = arith.constant 0 : i32
    %c0_i32_0 = arith.constant 0 : i32
    return %arg0, %c0_i32 : i32, i32
  }
  func.func @transform_1(%arg0: i32) -> (i32, i32) {
    %c0_i32 = arith.constant 0 : i32
    %c0_i32_0 = arith.constant 0 : i32
    %c0_i32_1 = arith.constant 0 : i32
    return %c0_i32, %c0_i32_0 : i32, i32
  }
  func.func @transform_2(%arg0: i32) -> (i32, i32) {
    %c0_i32 = arith.constant 0 : i32
    %c0_i32_0 = arith.constant 0 : i32
    %c0_i32_1 = arith.constant 0 : i32
    return %c0_i32, %c0_i32_0 : i32, i32
  }
  func.func @transform_3(%arg0: i32) -> (i32, i32) {
    %c0_i32 = arith.constant 0 : i32
    %c0_i32_0 = arith.constant 0 : i32
    return %arg0, %c0_i32 : i32, i32
  }
}

</mosaic_0001>

<bundles_post_ra>
// kernel: tpu_custom_call.1
= control target key start
LH: loop header
LB: loop body
LE: loop exit
PB: predicated region body
PF: predicated region fallthrough
CT: control target
= control target key end

     0   :  { %8 = vsyncpa [#allocation3], 0  ;;  %s238_s0 = inlined_call_operand.hbm [shape: f32[16,32], index: 0, kind: input, shape index: {}]   ;;  %s239_s1 = inlined_call_operand.vmem [shape: f32[1,32], index: 1, kind: input, shape index: {}]   ;;  %s240_s2 = inlined_call_operand.vmem [shape: f32[1,32], index: 2, kind: input, shape index: {}]   ;;  %s241_s3 = inlined_call_operand.hbm [shape: f32[16,32], index: 3, kind: output, shape index: {}]  }
   0x1   :  { %9 = vsyncpa [#allocation4], 0  ;;  %s172_s12 = smov [#allocation2]   ;;  %s124_s16 = scalar_lea.hbm %s238_s0, 256 }
   0x2   :  { %s15_s13 = sshll.u32 %s172_s12, 4  ;;  %p125_p0 = scmp.ne.s32.totalorder %s238_s0, %s124_s16  ;;  %s16_s13 = int_to_ptr.vmem [resolvable:$true] %s15_s13 }
   0x3   :  { %p128_p1 = scmp.lt.u32.totalorder %s124_s16, %s238_s0 }
   0x5   :  { %p130_p2 = pnand %p128_p1, %p125_p0 }
   0x7   :  { %133 = shalt.err (!%p130_p2)
}
   0x8   :  { %s134_s21 = scalar_lea.vmem %s16_s13, 256  ;;  %p139_p4 = scmp.lt.s32.totalorder %s16_s13, %s16_s13 }
   0x9   :  { %p135_p3 = scmp.ne.s32.totalorder %s16_s13, %s134_s21  ;;  %p140_p5 = scmp.lt.s32.totalorder %s134_s21, %s134_s21 }
   0xb   :  { %p141_p6 = por %p140_p5, %p139_p4 }
   0xd   :  { %p142_p7 = pnand %p141_p6, %p135_p3 }
   0xf   :  { %145 = shalt.err (!%p142_p7)
}
  0x10   :  { %s173_s22 = smov 128   ;;  %s174_s23 = smov 8  }
  0x11   :  { %21 = dma.hbm_to_vmem [thread:$0]  %s238_s0, 256, %s16_s13, [#allocation3], %s173_s22, %s173_s22, %s174_s23  }
  0x12   :  { %168 = dma.done.wait [#allocation3], 256  }
  0x13   :  { %169 = vsyncadd [#allocation3], 4294967040  ;;  %vm33_vm0 = vcmask 261120   ;;  %v29_v0 = vld [vmem:[#allocation2] sm:$0xff]  ;;  %v30_v1 = vld [vmem:[#allocation2 + $0x8] sm:$0xff]  ;;  %s175_s29 = smov [#allocation5]  }
  0x14   :  { %v34_v2 = vsel %vm33_vm0, %v29_v0, 0.0  ;;  %v37_v3 = vsel %vm33_vm0, %v30_v1, 0.0  ;;  %v110_v31 = vld [vmem:[%s239_s1] ss:$0 sm:$0xff]  ;;  %s98_s30 = sshll.u32 %s175_s29, 4  ;;  %s99_s30 = int_to_ptr.vmem [resolvable:$true] %s98_s30 }
  0x15   :  { %35 = vadd.xlane.f32.xlu0 %v34_v2  ;;  %v111_v33 = vld [vmem:[%s240_s2] ss:$0 sm:$0xff]  ;;  %s146_s4 = scalar_lea.vmem %s99_s30, 256  ;;  %p151_p9 = scmp.lt.s32.totalorder %s99_s30, %s99_s30 }
  0x16   :  { %p147_p8 = scmp.ne.s32.totalorder %s99_s30, %s146_s4  ;;  %p152_p10 = scmp.lt.s32.totalorder %s146_s4, %s146_s4 }
  0x18   :  { %p153_p11 = por %p152_p10, %p151_p9 }
  0x19   :  { %38 = vadd.xlane.f32.xlu0 %v37_v3 }
  0x1a   :  { %p154_p12 = pnand %p153_p11, %p147_p8 }
  0xa2   :  { %v36_v4 = vpop.xlane.xlu0 %35 }
  0xa3   :  { %v41_v5 = vmul.f32 0.03125, %v36_v4 }
  0xa5   :  { %v43_v6 = vsub.f32 %v29_v0, %v41_v5 }
  0xa6   :  { %v39_v7 = vpop.xlane.xlu0 %38 }
  0xa7   :  { %v42_v8 = vmul.f32 0.03125, %v39_v7  ;;  %v45_v9 = vmul.f32 %v43_v6, %v43_v6 }
  0xa9   :  { %v44_v10 = vsub.f32 %v30_v1, %v42_v8  ;;  %v47_v11 = vsel %vm33_vm0, %v45_v9, 0.0 }
  0xaa   :  { %48 = vadd.xlane.f32.xlu1 %v47_v11 }
  0xab   :  { %v46_v12 = vmul.f32 %v44_v10, %v44_v10 }
  0xad   :  { %v50_v13 = vsel %vm33_vm0, %v46_v12, 0.0 }
  0xae   :  { %51 = vadd.xlane.f32.xlu1 %v50_v13 }
 0x137   :  { %v49_v14 = vpop.xlane.xlu1 %48 }
 0x138   :  { %v53_v15 = vmul.f32 0.032258064, %v49_v14 }
 0x13a   :  { %116 = vrsqrt.f32 %v53_v15  ;;  %vm57_vm1 = vcmp.eq.f32.partialorder %v53_v15, inf  ;;  %v60_v20 = vand.u32 2147483648, %v53_v15  ;;  %vm59_vm2 = vcmp.eq.f32.partialorder %v53_v15, 0.0 }
 0x13b   :  { %v52_v16 = vpop.xlane.xlu1 %51 }
 0x13c   :  { %v54_v17 = vmul.f32 0.032258064, %v52_v16 }
 0x13e   :  { %118 = vrsqrt.f32 %v54_v17  ;;  %vm64_vm3 = vcmp.eq.f32.partialorder %v54_v17, inf  ;;  %v67_v26 = vand.u32 2147483648, %v54_v17  ;;  %vm66_vm4 = vcmp.eq.f32.partialorder %v54_v17, 0.0 }
 0x144   :  { %v117_v18 = vpop.eup %116 }
 0x145   :  { %v56_v19 = vmul.f32 %v117_v18, %v53_v15 }
 0x147   :  { %v58_v21 = vsel %vm57_vm1, %v53_v15, %v56_v19 }
 0x148   :  { %v119_v22 = vpop.eup %118  ;;  %v61_v23 = vsel %vm59_vm2, %v60_v20, %v58_v21 }
 0x149   :  { %v69_v24 = vadd.f32 1e-06, %v61_v23  ;;  %v63_v25 = vmul.f32 %v119_v22, %v54_v17 }
 0x14b   :  { %120 = vrcp.f32 %v69_v24  ;;  %v65_v27 = vsel %vm64_vm3, %v54_v17, %v63_v25 }
 0x14c   :  { %v68_v28 = vsel %vm66_vm4, %v67_v26, %v65_v27 }
 0x14d   :  { %v70_v29 = vadd.f32 1e-06, %v68_v28 }
 0x14f   :  { %122 = vrcp.f32 %v70_v29 }
 0x155   :  { %v121_v30 = vpop.eup %120 }
 0x156   :  { %v73_v32 = vmul.f32 %v121_v30, %v43_v6 }
 0x158   :  { %v81_v34 = vmul.f32 %v110_v31, %v73_v32 }
 0x159   :  { %v123_v35 = vpop.eup %122 }
 0x15a   :  { %v74_v36 = vmul.f32 %v123_v35, %v44_v10  ;;  %v89_v37 = vadd.f32 %v111_v33, %v81_v34 }
 0x15c   :  { %v82_v38 = vmul.f32 %v110_v31, %v74_v36  ;;  %91 = vst.msk [vmem:[#allocation5] sm:$0xff] %vm33_vm0, %v89_v37 }
 0x15e   :  { %v90_v39 = vadd.f32 %v111_v33, %v82_v38 }
 0x160   :  { %92 = vst.msk [vmem:[#allocation5 + $0x8] sm:$0xff] %vm33_vm0, %v90_v39 }
 0x161   :  { %157 = shalt.err (!%p154_p12)
}
 0x162   :  { %s158_s5 = scalar_lea.hbm %s241_s3, 256 }
 0x163   :  { %p159_p13 = scmp.ne.s32.totalorder %s241_s3, %s158_s5  ;;  %p162_p0 = scmp.lt.u32.totalorder %s158_s5, %s241_s3 }
 0x165   :  { %p164_p1 = pnand %p162_p0, %p159_p13 }
 0x167   :  { %167 = shalt.err (!%p164_p1)
}
 0x168   :  { %104 = dma.vmem_to_hbm [thread:$0]  %s99_s30, 256, %s241_s3, [#allocation4], %s173_s22, %s173_s22, %s174_s23  }
 0x169   :  { %170 = dma.done.wait [#allocation4], 256  }
 0x16a   :  { %171 = vsyncadd [#allocation4], 4294967040 }
 0x16b   :  { %108 = vsyncpa [#allocation3], 1 }
 0x16c   :  { %109 = vsyncpa [#allocation4], 1 }

</bundles_post_ra>
